<compile_context>
chip_gen: v7x
topology: tpu7x:2x2x1
jax: 0.10.0
libtpu: 0.0.40
codegen_flags: <defaults>
</compile_context>

<pallas_src>
import jax
import jax.numpy as jnp
from jax.experimental import pallas as pl
from jax.experimental.pallas import tpu as pltpu


def _round_up(a, b):
    return (a + b - 1) // b * b


def _vmem_capacity_bytes():
    try:
        return int(pltpu.get_tpu_info().vmem_capacity_bytes)
    except Exception:
        return 64 << 20  # conservative fallback (v7x per-core VMEM)


def _residency_bytes(tm, D, tH, x_bytes, cdt_bytes, out_bytes):
    """Approximate peak VMEM residency of one grid step (double buffers incl.)."""
    xb = 2 * tm * D * x_bytes                      # streamed x tile
    w12b = 2 * D * (2 * tH) * cdt_bytes            # streamed [w1|w2] tile
    b12b = 2 * (2 * tH) * 4
    wob = 2 * tH * D * cdt_bytes                   # streamed wo tile
    bob = 2 * D * 4
    ob = 2 * tm * D * out_bytes                    # output tile
    accb = tm * D * 4                              # f32 accumulator scratch
    interm = tm * (2 * tH) * 4 + tm * tH * (4 + cdt_bytes)   # h, gated (+cast)
    return xb + w12b + b12b + wob + bob + ob + accb + interm + (2 << 20)


def _pick_tile_m(M, tm_max):
    """Largest power-of-two tile <= tm_max with small M-padding waste."""
    cand = [t for t in (512, 256, 128, 64, 32, 16, 8) if t <= max(tm_max, 8)]
    for t in cand:
        if _round_up(M, t) - M <= max(M // 8, 7):
            return t
    return 8


# ---------------------------------------------------------------------------
# Kernel
# ---------------------------------------------------------------------------
def _swiglu_ffn_kernel(x_ref, w12_ref, b12_ref, wo_ref, bo_ref, o_ref, acc_ref):
    h_idx = pl.program_id(1)

    @pl.when(h_idx == 0)
    def _():
        acc_ref[...] = jnp.zeros_like(acc_ref)

    # Cast activations to the matmul dtype in-kernel (no extra HBM pass).
    x = x_ref[...].astype(w12_ref.dtype)                         # (tm, D)
    hv = jnp.dot(x, w12_ref[...], preferred_element_type=jnp.float32)
    hv = hv + b12_ref[...]                                       # (tm, 2*tH) f32
    tH = hv.shape[-1] // 2
    h1 = hv[:, :tH]                                              # w_1(x) tile
    h2 = hv[:, tH:]                                              # w_2(x) tile
    gated = h1 * (h2 * jax.nn.sigmoid(h2))                       # SiLU gate, f32
    acc_ref[...] += jnp.dot(gated.astype(wo_ref.dtype), wo_ref[...],
                            preferred_element_type=jnp.float32)

    @pl.when(h_idx == pl.num_programs(1) - 1)
    def _():
        o_ref[...] = (acc_ref[...] + bo_ref[...]).astype(o_ref.dtype)


# ---------------------------------------------------------------------------
# Host-side wrappers
# ---------------------------------------------------------------------------
def prepare_swiglu_params(w1, b1, w2, b2, wo, bo, *, tile_h=512, tile_m=None,
                          compute_dtype=jnp.bfloat16, out_dtype=None):
    """Fuse / pad / cast the SwiGLU weights once (hoisted out of the hot path).

    w1, w2: (D, H); wo: (H, D)  (transposed vs torch nn.Linear.weight).
    """
    D, H = w1.shape
    cdt = jnp.dtype(compute_dtype)
    cap = _vmem_capacity_bytes()
    budget = cap - (8 << 20)
    if tile_m is None:
        tile_m = 512 if cap >= (100 << 20) else 256   # bigger tiles on v5e/v6e

    # Hidden tile: multiple of 128 lanes, shrunk until streamed tiles fit VMEM.
    tH = min(_round_up(tile_h, 128), _round_up(H, 128))
    while tH > 128 and _residency_bytes(tile_m, D, tH, 4, cdt.itemsize, 4) > budget:
        tH -= 128
    Hp = _round_up(H, tH)
    n_h = Hp // tH

    # Zero-pad the hidden dim: padded columns give silu(0)*0 = 0 and hit zero
    # rows of wo, so they contribute nothing to the output.
    def pad_h(a, axis):
        if Hp == H:
            return a
        pad = [(0, 0)] * a.ndim
        pad[axis] = (0, Hp - H)
        return jnp.pad(a, pad)

    w1p = pad_h(w1, 1).astype(cdt)                    # (D, Hp)
    w2p = pad_h(w2, 1).astype(cdt)
    b1p = pad_h(b1.reshape(1, H), 1).astype(jnp.float32)
    b2p = pad_h(b2.reshape(1, H), 1).astype(jnp.float32)
    wop = pad_h(wo, 0).astype(cdt)                    # (Hp, D)
    bop = bo.reshape(1, D).astype(jnp.float32)

    # Block-interleave w1/w2 per hidden tile so the kernel's h[:, :tH]/h[:, tH:]
    # split is lane-aligned (tH is a multiple of 128 lanes).
    w12 = jnp.concatenate(
        [w1p.reshape(D, n_h, tH), w2p.reshape(D, n_h, tH)], axis=2
    ).reshape(D, 2 * Hp)
    b12 = jnp.concatenate(
        [b1p.reshape(1, n_h, tH), b2p.reshape(1, n_h, tH)], axis=2
    ).reshape(1, 2 * Hp)

    return dict(w12=w12, b12=b12, wo=wop, bo=bop, D=D, H=H, Hp=Hp, tile_h=tH,
                tile_m=tile_m, compute_dtype=cdt,
                out_dtype=jnp.dtype(out_dtype) if out_dtype is not None else None,
                vmem_cap=cap)


def swiglu_ffn_apply(x, params):
    """x: (M, D) -> (M, D) in x.dtype (or params['out_dtype'])."""
    M, D = x.shape
    Hp, tH = params["Hp"], params["tile_h"]
    cdt = params["compute_dtype"]
    out_dtype = params["out_dtype"] or x.dtype
    w12, b12, wo, bo = params["w12"], params["b12"], params["wo"], params["bo"]

    tm = _pick_tile_m(M, params["tile_m"])
    Mp = _round_up(M, tm)
    xp = jnp.pad(x, ((0, Mp - M), (0, 0))) if Mp != M else x
    n_m, n_h = Mp // tm, Hp // tH

    x_bytes = jnp.dtype(x.dtype).itemsize
    o_bytes = jnp.dtype(out_dtype).itemsize
    needed = _residency_bytes(tm, D, tH, x_bytes, cdt.itemsize, o_bytes)
    vmem_limit = int(min(params["vmem_cap"] - (8 << 20), max(needed, 32 << 20)))

    cost = pl.CostEstimate(
        flops=int(2 * Mp * D * (2 * Hp) + 2 * Mp * Hp * D + 5 * Mp * Hp),
        transcendentals=int(Mp * Hp),
        bytes_accessed=int(
            xp.size * x_bytes
            + n_m * (w12.size + wo.size) * cdt.itemsize
            + n_m * (b12.size + bo.size) * 4
            + Mp * D * o_bytes),
    )

    out = pl.pallas_call(
        _swiglu_ffn_kernel,
        out_shape=jax.ShapeDtypeStruct((Mp, D), out_dtype),
        grid_spec=pltpu.PrefetchScalarGridSpec(
            num_scalar_prefetch=0,
            grid=(n_m, n_h),
            in_specs=[
                pl.BlockSpec((tm, D), lambda i, h: (i, 0)),        # x tile (resident over h)
                pl.BlockSpec((D, 2 * tH), lambda i, h: (0, h)),    # streamed [w1|w2] tile
                pl.BlockSpec((1, 2 * tH), lambda i, h: (0, h)),    # [b1|b2] tile
                pl.BlockSpec((tH, D), lambda i, h: (h, 0)),        # streamed wo tile
                pl.BlockSpec((1, D), lambda i, h: (0, 0)),         # bo (grid-invariant)
            ],
            out_specs=pl.BlockSpec((tm, D), lambda i, h: (i, 0)),
            scratch_shapes=[pltpu.VMEM((tm, D), jnp.float32)],
        ),
        compiler_params=pltpu.CompilerParams(
            dimension_semantics=("parallel", "arbitrary"),
            vmem_limit_bytes=vmem_limit,
        ),
        cost_estimate=cost,
    )(xp, w12, b12, wo, bo)

    return out[:M] if Mp != M else out


def make_swiglu_ffn(w1, b1, w2, b2, wo, bo, **kwargs):
    """Hoists weight fusion/cast out of the hot path; returns apply(x)."""
    params = prepare_swiglu_params(w1, b1, w2, b2, wo, bo, **kwargs)

    def apply(x):
        return swiglu_ffn_apply(x, params)

    return apply


def swiglu_ffn(x, w1, b1, w2, b2, wo, bo, *, tile_h=512, tile_m=None,
               compute_dtype=jnp.bfloat16):
    """One-shot convenience wrapper (prefer make_swiglu_ffn for repeated calls)."""
    params = prepare_swiglu_params(w1, b1, w2, b2, wo, bo, tile_h=tile_h,
                                   tile_m=tile_m, compute_dtype=compute_dtype)
    return swiglu_ffn_apply(x, params)


def swiglu_ffn_ref(x, w1, b1, w2, b2, wo, bo):
    h1 = x @ w1 + b1
    h2 = x @ w2 + b2
    return (h1 * (h2 * jax.nn.sigmoid(h2))) @ wo + bo


if __name__ == "__main__":
    batch, seq = 2, 8
    input_dim, hidden_dim = 128, 256

    key = jax.random.PRNGKey(0)
    kx, k1, kb1, k2, kb2, ko, kbo = jax.random.split(key, 7)

    # Deterministic synthetic parameters (same shapes as nn.Linear, stored
    # transposed for the row-major x @ W convention used here).
    x = jax.random.normal(kx, (batch, seq, input_dim), dtype=jnp.float32)
    w1 = jax.random.normal(k1, (input_dim, hidden_dim), dtype=jnp.float32) * 0.02
    b1 = jax.random.normal(kb1, (hidden_dim,), dtype=jnp.float32) * 0.02
    w2 = jax.random.normal(k2, (input_dim, hidden_dim), dtype=jnp.float32) * 0.02
    b2 = jax.random.normal(kb2, (hidden_dim,), dtype=jnp.float32) * 0.02
    wo = jax.random.normal(ko, (hidden_dim, input_dim), dtype=jnp.float32) * 0.02
    bo = jax.random.normal(kbo, (input_dim,), dtype=jnp.float32) * 0.02

    x2d = x.reshape(batch * seq, input_dim)
    ref = swiglu_ffn_ref(x2d, w1, b1, w2, b2, wo, bo)

    # 1) f32-compute path (tight tolerance).
    ffn_f32 = make_swiglu_ffn(w1, b1, w2, b2, wo, bo, compute_dtype=jnp.float32)
    out_f32 = jax.block_until_ready(ffn_f32(x2d))
    assert out_f32.shape == (batch * seq, input_dim)
    assert out_f32.reshape(batch, seq, input_dim).shape == (batch, seq, input_dim)
    assert jnp.allclose(out_f32, ref, atol=1e-4, rtol=1e-4)

    # 2) Default bf16-matmul path (native MXU dtype, looser tolerance).
    ffn_bf16 = make_swiglu_ffn(w1, b1, w2, b2, wo, bo)
    out_bf16 = jax.block_until_ready(ffn_bf16(x2d))
    assert jnp.allclose(out_bf16, ref, atol=3e-2, rtol=3e-2)

    # 3) H-tiled streaming path (tile_h=128 -> 2 hidden tiles, exercises the
    #    accumulator) plus ragged M (exercises adaptive M padding).
    ffn_tiled = make_swiglu_ffn(w1, b1, w2, b2, wo, bo, tile_h=128)
    x_odd = x2d[:13]
    out_odd = jax.block_until_ready(ffn_tiled(x_odd))
    ref_odd = swiglu_ffn_ref(x_odd, w1, b1, w2, b2, wo, bo)
    assert out_odd.shape == (13, input_dim)
    assert jnp.allclose(out_odd, ref_odd, atol=3e-2, rtol=3e-2)

    print("KERNEL_OK")
</pallas_src>

<mosaic_0001>
module attributes {stable_mosaic.version = 11 : i64} {
  func.func @_swiglu_ffn_kernel(%arg0: i32, %arg1: i32, %arg2: memref<16x128xf32, #tpu.memory_space<vmem>>, %arg3: memref<128x512xf32, #tpu.memory_space<vmem>>, %arg4: memref<1x512xf32, #tpu.memory_space<vmem>>, %arg5: memref<256x128xf32, #tpu.memory_space<vmem>>, %arg6: memref<1x128xf32, #tpu.memory_space<vmem>>, %arg7: memref<16x128xf32, #tpu.memory_space<vmem>>, %arg8: memref<16x128xf32, #tpu.memory_space<vmem>>) attributes {dimension_semantics = [#tpu.dimension_semantics<parallel>, #tpu.dimension_semantics<arbitrary>], iteration_bounds = array<i64: 1, 1>, scalar_prefetch = 0 : i64, scratch_operands = 1 : i64, tpu.core_type = #tpu.core_type<tc>, window_params = [{transform_indices = @transform_0, window_bounds = array<i64: 16, 128>}, {transform_indices = @transform_1, window_bounds = array<i64: 128, 512>}, {transform_indices = @transform_2, window_bounds = array<i64: 1, 512>}, {transform_indices = @transform_3, window_bounds = array<i64: 256, 128>}, {pipeline_mode = #tpu.pipeline_mode<synchronous>, transform_indices = @transform_4, window_bounds = array<i64: 1, 128>}, {transform_indices = @transform_5, window_bounds = array<i64: 16, 128>}]} {
    %c0_i32 = arith.constant 0 : i32
    %0 = arith.cmpi eq, %arg1, %c0_i32 : i32
    %1 = arith.extui %0 : i1 to i32
    %c0_i32_0 = arith.constant 0 : i32
    %2 = arith.cmpi ne, %1, %c0_i32_0 : i32
    scf.if %2 {
      %cst_16 = arith.constant 0.000000e+00 : f32
      %26 = vector.broadcast %cst_16 : f32 to vector<16x128xf32>
      %c0_17 = arith.constant 0 : index
      %c0_18 = arith.constant 0 : index
      %27 = vector.load %arg8[%c0_17, %c0_18] : memref<16x128xf32, #tpu.memory_space<vmem>>, vector<16x128xf32>
      tpu.vector_store %arg8[%c0_17, %c0_18], %26 {strides = array<i32>} : memref<16x128xf32, #tpu.memory_space<vmem>>, vector<16x128xf32>,
    } else {
    }
    %c0 = arith.constant 0 : index
    %c0_1 = arith.constant 0 : index
    %3 = vector.load %arg2[%c0, %c0_1] : memref<16x128xf32, #tpu.memory_space<vmem>>, vector<16x128xf32>
    %c0_2 = arith.constant 0 : index
    %c0_3 = arith.constant 0 : index
    %4 = vector.load %arg3[%c0_2, %c0_3] : memref<128x512xf32, #tpu.memory_space<vmem>>, vector<128x512xf32>
    %cst = arith.constant dense<0.000000e+00> : vector<16x512xf32>
    %5 = tpu.matmul %3, %4, %cst {dimension_numbers = #tpu.dot_dimension_numbers<[1], [0], [0], [1], [0, 0, 1, 1], [], []>} : vector<16x128xf32>, vector<128x512xf32>, vector<16x512xf32> -> vector<16x512xf32>
    %c0_4 = arith.constant 0 : index
    %c0_5 = arith.constant 0 : index
    %6 = vector.load %arg4[%c0_4, %c0_5] : memref<1x512xf32, #tpu.memory_space<vmem>>, vector<1x512xf32>
    %7 = vector.broadcast %6 : vector<1x512xf32> to vector<16x512xf32>
    %8 = arith.addf %5, %7 : vector<16x512xf32>
    %9 = vector.extract_strided_slice %8 {offsets = [0, 0], sizes = [16, 256], strides = [1, 1]} : vector<16x512xf32> to vector<16x256xf32>
    %10 = vector.extract_strided_slice %8 {offsets = [0, 256], sizes = [16, 256], strides = [1, 1]} : vector<16x512xf32> to vector<16x256xf32>
    %11 = arith.negf %10 : vector<16x256xf32>
    %12 = math.exp %11 : vector<16x256xf32>
    %cst_6 = arith.constant 1.000000e+00 : f32
    %13 = vector.broadcast %cst_6 : f32 to vector<16x256xf32>
    %14 = arith.addf %13, %12 : vector<16x256xf32>
    %15 = arith.divf %13, %14 : vector<16x256xf32>
    %16 = arith.mulf %10, %15 : vector<16x256xf32>
    %17 = arith.mulf %9, %16 : vector<16x256xf32>
    %c0_7 = arith.constant 0 : index
    %c0_8 = arith.constant 0 : index
    %18 = vector.load %arg8[%c0_7, %c0_8] : memref<16x128xf32, #tpu.memory_space<vmem>>, vector<16x128xf32>
    %c0_9 = arith.constant 0 : index
    %c0_10 = arith.constant 0 : index
    %19 = vector.load %arg5[%c0_9, %c0_10] : memref<256x128xf32, #tpu.memory_space<vmem>>, vector<256x128xf32>
    %cst_11 = arith.constant dense<0.000000e+00> : vector<16x128xf32>
    %20 = tpu.matmul %17, %19, %cst_11 {dimension_numbers = #tpu.dot_dimension_numbers<[1], [0], [0], [1], [0, 0, 1, 1], [], []>} : vector<16x256xf32>, vector<256x128xf32>, vector<16x128xf32> -> vector<16x128xf32>
    %21 = arith.addf %18, %20 : vector<16x128xf32>
    %c0_12 = arith.constant 0 : index
    %c0_13 = arith.constant 0 : index
    %22 = vector.load %arg8[%c0_12, %c0_13] : memref<16x128xf32, #tpu.memory_space<vmem>>, vector<16x128xf32>
    tpu.vector_store %arg8[%c0_12, %c0_13], %21 {strides = array<i32>} : memref<16x128xf32, #tpu.memory_space<vmem>>, vector<16x128xf32>,
    %c0_i32_14 = arith.constant 0 : i32
    %23 = arith.cmpi eq, %arg1, %c0_i32_14 : i32
    %24 = arith.extui %23 : i1 to i32
    %c0_i32_15 = arith.constant 0 : i32
    %25 = arith.cmpi ne, %24, %c0_i32_15 : i32
    scf.if %25 {
      %c0_16 = arith.constant 0 : index
      %c0_17 = arith.constant 0 : index
      %26 = vector.load %arg8[%c0_16, %c0_17] : memref<16x128xf32, #tpu.memory_space<vmem>>, vector<16x128xf32>
      %c0_18 = arith.constant 0 : index
      %c0_19 = arith.constant 0 : index
      %27 = vector.load %arg6[%c0_18, %c0_19] : memref<1x128xf32, #tpu.memory_space<vmem>>, vector<1x128xf32>
      %28 = vector.broadcast %27 : vector<1x128xf32> to vector<16x128xf32>
      %29 = arith.addf %26, %28 : vector<16x128xf32>
      %c0_20 = arith.constant 0 : index
      %c0_21 = arith.constant 0 : index
      %30 = vector.load %arg7[%c0_20, %c0_21] : memref<16x128xf32, #tpu.memory_space<vmem>>, vector<16x128xf32>
      tpu.vector_store %arg7[%c0_20, %c0_21], %29 {strides = array<i32>} : memref<16x128xf32, #tpu.memory_space<vmem>>, vector<16x128xf32>,
    } else {
    }
    return
  }
  func.func @transform_0(%arg0: i32, %arg1: i32) -> (i32, i32) {
    %c0_i32 = arith.constant 0 : i32
    %c0_i32_0 = arith.constant 0 : i32
    return %arg0, %c0_i32 : i32, i32
  }
  func.func @transform_1(%arg0: i32, %arg1: i32) -> (i32, i32) {
    %c0_i32 = arith.constant 0 : i32
    %c0_i32_0 = arith.constant 0 : i32
    return %c0_i32, %arg1 : i32, i32
  }
  func.func @transform_2(%arg0: i32, %arg1: i32) -> (i32, i32) {
    %c0_i32 = arith.constant 0 : i32
    %c0_i32_0 = arith.constant 0 : i32
    return %c0_i32, %arg1 : i32, i32
  }
  func.func @transform_3(%arg0: i32, %arg1: i32) -> (i32, i32) {
    %c0_i32 = arith.constant 0 : i32
    %c0_i32_0 = arith.constant 0 : i32
    return %arg1, %c0_i32 : i32, i32
  }
  func.func @transform_4(%arg0: i32, %arg1: i32) -> (i32, i32) {
    %c0_i32 = arith.constant 0 : i32
    %c0_i32_0 = arith.constant 0 : i32
    %c0_i32_1 = arith.constant 0 : i32
    return %c0_i32, %c0_i32_0 : i32, i32
  }
  func.func @transform_5(%arg0: i32, %arg1: i32) -> (i32, i32) {
    %c0_i32 = arith.constant 0 : i32
    %c0_i32_0 = arith.constant 0 : i32
    return %arg0, %c0_i32 : i32, i32
  }
}

</mosaic_0001>

<bundles_post_ra>
// kernel: tpu_custom_call.1
= control target key start
LH: loop header
LB: loop body
LE: loop exit
PB: predicated region body
PF: predicated region fallthrough
CT: control target
= control target key end

     0   :  { %10 = vsyncpa [#allocation4], 0  ;;  %s869_s0 = inlined_call_operand.hbm [shape: f32[16,128], index: 0, kind: input, shape index: {}]   ;;  %s870_s1 = inlined_call_operand.hbm [shape: f32[128,512], index: 1, kind: input, shape index: {}]   ;;  %s871_s2 = inlined_call_operand.vmem [shape: f32[1,512], index: 2, kind: input, shape index: {}]   ;;  %s872_s3 = inlined_call_operand.hbm [shape: f32[256,128], index: 3, kind: input, shape index: {}]   ;;  %s873_s4 = inlined_call_operand.vmem [shape: f32[1,128], index: 4, kind: input, shape index: {}]   ;;  %s874_s5 = inlined_call_operand.hbm [shape: f32[16,128], index: 5, kind: output, shape index: {}]  }
   0x1   :  { %11 = vsyncpa [#allocation7], 0 }
   0x2   :  { %12 = vsyncpa [#allocation5], 0  ;;  %s763_s18 = smov [#allocation6]   ;;  %s669_s22 = scalar_lea.hbm %s870_s1, 8192 }
   0x3   :  { %s30_s19 = sshll.u32 %s763_s18, 4  ;;  %p670_p0 = scmp.ne.s32.totalorder %s870_s1, %s669_s22  ;;  %s31_s19 = int_to_ptr.vmem [resolvable:$true] %s30_s19 }
   0x4   :  { %p673_p1 = scmp.lt.u32.totalorder %s669_s22, %s870_s1 }
   0x6   :  { %p675_p2 = pnand %p673_p1, %p670_p0 }
   0x8   :  { %678 = shalt.err (!%p675_p2)
}
   0x9   :  { %s679_s27 = scalar_lea.vmem %s31_s19, 8192  ;;  %p684_p4 = scmp.lt.s32.totalorder %s31_s19, %s31_s19 }
   0xa   :  { %p680_p3 = scmp.ne.s32.totalorder %s31_s19, %s679_s27  ;;  %p685_p5 = scmp.lt.s32.totalorder %s679_s27, %s679_s27 }
   0xc   :  { %p686_p6 = por %p685_p5, %p684_p4 }
   0xe   :  { %p687_p7 = pnand %p686_p6, %p680_p3 }
  0x10   :  { %690 = shalt.err (!%p687_p7)
}
  0x11   :  { %s764_s28 = smov 512   ;;  %s765_s29 = smov 32  }
  0x12   :  { %36 = dma.hbm_to_vmem [thread:$0]  %s870_s1, 8192, %s31_s19, [#allocation7], %s764_s28, %s764_s28, %s765_s29  }
  0x13   :  { %s766_s7 = smov [#allocation3]   ;;  %s691_s11 = scalar_lea.hbm %s869_s0, 256 }
  0x14   :  { %s18_s8 = sshll.u32 %s766_s7, 4  ;;  %p692_p8 = scmp.ne.s32.totalorder %s869_s0, %s691_s11  ;;  %s19_s8 = int_to_ptr.vmem [resolvable:$true] %s18_s8 }
  0x15   :  { %p695_p9 = scmp.lt.u32.totalorder %s691_s11, %s869_s0 }
  0x17   :  { %p697_p10 = pnand %p695_p9, %p692_p8 }
  0x19   :  { %700 = shalt.err (!%p697_p10)
}
  0x1a   :  { %s701_s16 = scalar_lea.vmem %s19_s8, 256  ;;  %p706_p12 = scmp.lt.s32.totalorder %s19_s8, %s19_s8 }
  0x1b   :  { %p702_p11 = scmp.ne.s32.totalorder %s19_s8, %s701_s16  ;;  %p707_p13 = scmp.lt.s32.totalorder %s701_s16, %s701_s16 }
  0x1d   :  { %p708_p0 = por %p707_p13, %p706_p12 }
  0x1f   :  { %p709_p1 = pnand %p708_p0, %p702_p11 }
  0x21   :  { %712 = shalt.err (!%p709_p1)
}
  0x22   :  { %s767_s1 = smov 128   ;;  %s768_s17 = smov 8  }
  0x23   :  { %24 = dma.hbm_to_vmem [thread:$0]  %s869_s0, 256, %s19_s8, [#allocation4], %s767_s1, %s767_s1, %s768_s17  }
  0x24   :  { %s769_s20 = smov [#allocation8]   ;;  %s713_s24 = scalar_lea.hbm %s872_s3, 4096 }
  0x25   :  { %s44_s21 = sshll.u32 %s769_s20, 4  ;;  %p714_p2 = scmp.ne.s32.totalorder %s872_s3, %s713_s24  ;;  %s45_s21 = int_to_ptr.vmem [resolvable:$true] %s44_s21 }
  0x26   :  { %p717_p3 = scmp.lt.u32.totalorder %s713_s24, %s872_s3 }
  0x28   :  { %p719_p4 = pnand %p717_p3, %p714_p2 }
  0x2a   :  { %722 = shalt.err (!%p719_p4)
}
  0x2b   :  { %s723_s29 = scalar_lea.vmem %s45_s21, 4096  ;;  %p728_p6 = scmp.lt.s32.totalorder %s45_s21, %s45_s21 }
  0x2c   :  { %p724_p5 = scmp.ne.s32.totalorder %s45_s21, %s723_s29  ;;  %p729_p7 = scmp.lt.s32.totalorder %s723_s29, %s723_s29 }
  0x2e   :  { %p730_p8 = por %p729_p7, %p728_p6 }
  0x30   :  { %p731_p9 = pnand %p730_p8, %p724_p5 }
  0x32   :  { %734 = shalt.err (!%p731_p9)
}
  0x33   :  { %50 = dma.hbm_to_vmem [thread:$0]  %s872_s3, 4096, %s45_s21, [#allocation7], %s767_s1, %s767_s1, %s768_s17  }
  0x34   :  { %757 = dma.done.wait [#allocation4], 256  }
  0x35   :  { %758 = vsyncadd [#allocation4], 4294967040 }
  0x36   :  { %759 = dma.done.wait [#allocation7], 12288  }
  0x37   :  { %760 = vsyncadd [#allocation7], 4294955008  ;;  %v770_v0 = vmov 0.0   ;;  %v73_v1 = vld [vmem:[#allocation6 + $0x18] sm:$0xff]  ;;  %v72_v3 = vld [vmem:[#allocation6 + $0x10] sm:$0xff]  ;;  %s771_s8 = smov [#allocation9]  }
  0x38   :  { %297 = vmatprep.mubr.f32.mxu1 %v770_v0  ;;  %220 = vmatprep.mubr.f32.mxu0 %v770_v0  ;;  %v77_v2 = vld [vmem:[#allocation6 + $0x38] sm:$0xff]  ;;  %v76_v5 = vld [vmem:[#allocation6 + $0x30] sm:$0xff]  ;;  %v71_v25 = vld [vmem:[#allocation6 + $0x8] sm:$0xff]  ;;  %s476_s9 = sshll.u32 %s771_s8, 4  ;;  %s477_s9 = int_to_ptr.vmem [resolvable:$true] %s476_s9 }
  0x39   :  { %v564_v4 = vpack.c.bf16 %v77_v2, %v73_v1  ;;  %v81_v6 = vld [vmem:[#allocation6 + $0x58] sm:$0xff]  ;;  %v566_v8 = vpack.c.bf16 %v76_v5, %v72_v3  ;;  %v80_v10 = vld [vmem:[#allocation6 + $0x50] sm:$0xff]  ;;  %v75_v26 = vld [vmem:[#allocation6 + $0x28] sm:$0xff]  ;;  %s735_s10 = scalar_lea.vmem %s477_s9, 256  ;;  %p740_p11 = scmp.lt.s32.totalorder %s477_s9, %s477_s9 }
  0x3a   :  { %v85_v7 = vld [vmem:[#allocation6 + $0x78] sm:$0xff]  ;;  %v84_v11 = vld [vmem:[#allocation6 + $0x70] sm:$0xff]  ;;  %v532_v28 = vpack.c.bf16 %v75_v26, %v71_v25  ;;  %v70_v29 = vld [vmem:[#allocation6] sm:$0xff]  ;;  %p736_p10 = scmp.ne.s32.totalorder %s477_s9, %s735_s10  ;;  %p741_p12 = scmp.lt.s32.totalorder %s735_s10, %s735_s10 }
  0x3b   :  { %v568_v9 = vpack.c.bf16 %v85_v7, %v81_v6  ;;  %v89_v12 = vld [vmem:[#allocation6 + $0x98] sm:$0xff]  ;;  %565 = vmatprep.subr.bf16.mxu1 %v564_v4  ;;  %v570_v14 = vpack.c.bf16 %v84_v11, %v80_v10  ;;  %v88_v16 = vld [vmem:[#allocation6 + $0x90] sm:$0xff]  ;;  %v74_v30 = vld [vmem:[#allocation6 + $0x20] sm:$0xff] }
  0x3c   :  { %v93_v13 = vld [vmem:[#allocation6 + $0xb8] sm:$0xff]  ;;  %567 = vmatpush1.bf16.msra.mxu1 %v566_v8  ;;  %v92_v17 = vld [vmem:[#allocation6 + $0xb0] sm:$0xff]  ;;  %v534_v33 = vpack.c.bf16 %v74_v30, %v70_v29  ;;  %533 = vmatprep.subr.bf16.mxu0 %v532_v28  ;;  %v79_v36 = vld [vmem:[#allocation6 + $0x48] sm:$0xff]  ;;  %p742_p13 = por %p741_p12, %p740_p11 }
  0x3d   :  { %569 = vmatprep.subr.bf16.mxu1 %v568_v9  ;;  %v572_v15 = vpack.c.bf16 %v93_v13, %v89_v12  ;;  %v97_v18 = vld [vmem:[#allocation6 + $0xd8] sm:$0xff]  ;;  %v574_v20 = vpack.c.bf16 %v92_v17, %v88_v16  ;;  %v96_v21 = vld [vmem:[#allocation6 + $0xd0] sm:$0xff]  ;;  %v83_v37 = vld [vmem:[#allocation6 + $0x68] sm:$0xff] }
  0x3e   :  { %v101_v19 = vld [vmem:[#allocation6 + $0xf8] sm:$0xff]  ;;  %v100_v22 = vld [vmem:[#allocation6 + $0xf0] sm:$0xff]  ;;  %v78_v38 = vld [vmem:[#allocation6 + $0x40] sm:$0xff]  ;;  %535 = vmatpush1.bf16.msra.mxu0 %v534_v33  ;;  %v536_v41 = vpack.c.bf16 %v83_v37, %v79_v36  ;;  %p743_p0 = pnand %p742_p13, %p736_p10 }
  0x3f   :  { %v576_v23 = vpack.c.bf16 %v101_v19, %v97_v18  ;;  %v105_v24 = vld [vmem:[#allocation6 + $0x118] sm:$0xff]  ;;  %v104_v31 = vld [vmem:[#allocation6 + $0x110] sm:$0xff]  ;;  %v578_v34 = vpack.c.bf16 %v100_v22, %v96_v21  ;;  %v82_v42 = vld [vmem:[#allocation6 + $0x60] sm:$0xff] }
  0x40   :  { %571 = vmatpush1.bf16.msra.mxu1 %v570_v14  ;;  %v109_v27 = vld [vmem:[#allocation6 + $0x138] sm:$0xff]  ;;  %v108_v32 = vld [vmem:[#allocation6 + $0x130] sm:$0xff]  ;;  %v87_v43 = vld [vmem:[#allocation6 + $0x88] sm:$0xff]  ;;  %v538_v44 = vpack.c.bf16 %v82_v42, %v78_v38  ;;  %537 = vmatprep.subr.bf16.mxu0 %v536_v41 }
  0x41   :  { %573 = vmatprep.subr.bf16.mxu1 %v572_v15  ;;  %v113_v35 = vld [vmem:[#allocation6 + $0x158] sm:$0xff]  ;;  %v580_v39 = vpack.c.bf16 %v109_v27, %v105_v24  ;;  %v91_v45 = vld [vmem:[#allocation6 + $0xa8] sm:$0xff]  ;;  %v86_v46 = vld [vmem:[#allocation6 + $0x80] sm:$0xff]  ;;  %v582_v51 = vpack.c.bf16 %v108_v32, %v104_v31 }
  0x42   :  { %v117_v40 = vld [vmem:[#allocation6 + $0x178] sm:$0xff]  ;;  %v90_v47 = vld [vmem:[#allocation6 + $0xa0] sm:$0xff]  ;;  %v540_v48 = vpack.c.bf16 %v91_v45, %v87_v43  ;;  %v95_v49 = vld [vmem:[#allocation6 + $0xc8] sm:$0xff]  ;;  %539 = vmatpush1.bf16.msra.mxu0 %v538_v44 }
  0x43   :  { %v99_v50 = vld [vmem:[#allocation6 + $0xe8] sm:$0xff]  ;;  %v584_v52 = vpack.c.bf16 %v117_v40, %v113_v35  ;;  %v112_v53 = vld [vmem:[#allocation6 + $0x150] sm:$0xff]  ;;  %v121_v55 = vld [vmem:[#allocation6 + $0x198] sm:$0xff]  ;;  %v542_v56 = vpack.c.bf16 %v90_v47, %v86_v46 }
  0x44   :  { %575 = vmatpush1.bf16.msra.mxu1 %v574_v20  ;;  %v116_v54 = vld [vmem:[#allocation6 + $0x170] sm:$0xff]  ;;  %v125_v57 = vld [vmem:[#allocation6 + $0x1b8] sm:$0xff]  ;;  %541 = vmatprep.subr.bf16.mxu0 %v540_v48  ;;  %v544_v58 = vpack.c.bf16 %v99_v50, %v95_v49  ;;  %v94_v59 = vld [vmem:[#allocation6 + $0xc0] sm:$0xff] }
  0x45   :  { %577 = vmatprep.subr.bf16.mxu1 %v576_v23  ;;  %v98_v60 = vld [vmem:[#allocation6 + $0xe0] sm:$0xff]  ;;  %v103_v61 = vld [vmem:[#allocation6 + $0x108] sm:$0xff]  ;;  %v586_v63 = vpack.c.bf16 %v116_v54, %v112_v53  ;;  %v588_v1 = vpack.c.bf16 %v125_v57, %v121_v55  ;;  %v120_v2 = vld [vmem:[#allocation6 + $0x190] sm:$0xff] }
  0x46   :  { %v107_v62 = vld [vmem:[#allocation6 + $0x128] sm:$0xff]  ;;  %v124_v3 = vld [vmem:[#allocation6 + $0x1b0] sm:$0xff]  ;;  %v129_v4 = vld [vmem:[#allocation6 + $0x1d8] sm:$0xff]  ;;  %543 = vmatpush1.bf16.msra.mxu0 %v542_v56  ;;  %v546_v5 = vpack.c.bf16 %v98_v60, %v94_v59 }
  0x47   :  { %v133_v6 = vld [vmem:[#allocation6 + $0x1f8] sm:$0xff]  ;;  %545 = vmatprep.subr.bf16.mxu0 %v544_v58  ;;  %v548_v7 = vpack.c.bf16 %v107_v62, %v103_v61  ;;  %v102_v8 = vld [vmem:[#allocation6 + $0x100] sm:$0xff]  ;;  %v111_v10 = vld [vmem:[#allocation6 + $0x148] sm:$0xff]  ;;  %v590_v12 = vpack.c.bf16 %v124_v3, %v120_v2 }
  0x48   :  { %579 = vmatpush1.bf16.msra.mxu1 %v578_v34  ;;  %v106_v9 = vld [vmem:[#allocation6 + $0x120] sm:$0xff]  ;;  %v115_v11 = vld [vmem:[#allocation6 + $0x168] sm:$0xff]  ;;  %v592_v13 = vpack.c.bf16 %v133_v6, %v129_v4  ;;  %v128_v14 = vld [vmem:[#allocation6 + $0x1d0] sm:$0xff] }
  0x49   :  { %581 = vmatprep.subr.bf16.mxu1 %v580_v39  ;;  %v132_v15 = vld [vmem:[#allocation6 + $0x1f0] sm:$0xff]  ;;  %v550_v16 = vpack.c.bf16 %v106_v9, %v102_v8  ;;  %v552_v17 = vpack.c.bf16 %v115_v11, %v111_v10  ;;  %v110_v18 = vld [vmem:[#allocation6 + $0x140] sm:$0xff]  ;;  %v119_v20 = vld [vmem:[#allocation6 + $0x188] sm:$0xff] }
  0x4a   :  { %547 = vmatpush1.bf16.msra.mxu0 %v546_v5  ;;  %v114_v19 = vld [vmem:[#allocation6 + $0x160] sm:$0xff]  ;;  %v123_v21 = vld [vmem:[#allocation6 + $0x1a8] sm:$0xff]  ;;  %v594_v22 = vpack.c.bf16 %v132_v15, %v128_v14  ;;  %v68_v29 = vld [vmem:[#allocation3] sm:$0xff] }
  0x4b   :  { %549 = vmatprep.subr.bf16.mxu0 %v548_v7  ;;  %v554_v23 = vpack.c.bf16 %v114_v19, %v110_v18  ;;  %v556_v24 = vpack.c.bf16 %v123_v21, %v119_v20  ;;  %v118_v25 = vld [vmem:[#allocation6 + $0x180] sm:$0xff]  ;;  %v127_v27 = vld [vmem:[#allocation6 + $0x1c8] sm:$0xff]  ;;  %v69_v34 = vld [vmem:[#allocation3 + $0x8] sm:$0xff]  ;;  %v136_v20 = vlaneseq }
  0x4c   :  { %583 = vmatpush1.bf16.msra.mxu1 %v582_v51  ;;  %v122_v26 = vld [vmem:[#allocation6 + $0x1a0] sm:$0xff]  ;;  %v131_v28 = vld [vmem:[#allocation6 + $0x1e8] sm:$0xff]  ;;  %v362_v42 = vld [vmem:[#allocation8 + $0x90] sm:$0xff] }
  0x4d   :  { %585 = vmatprep.subr.bf16.mxu1 %v584_v52  ;;  %v558_v30 = vpack.c.bf16 %v122_v26, %v118_v25  ;;  %v560_v31 = vpack.c.bf16 %v131_v28, %v127_v27  ;;  %v126_v32 = vld [vmem:[#allocation6 + $0x1c0] sm:$0xff]  ;;  %v361_v37 = vld [vmem:[#allocation8 + $0x88] sm:$0xff]  ;;  %v363_v43 = vld [vmem:[#allocation8 + $0x98] sm:$0xff]  ;;  %v137_v21 = vshrl.u32 %v136_v20, 7 }
  0x4e   :  { %551 = vmatpush1.bf16.msra.mxu0 %v550_v16  ;;  %v130_v33 = vld [vmem:[#allocation6 + $0x1e0] sm:$0xff]  ;;  %v345_v40 = vld [vmem:[#allocation8 + $0x8] sm:$0xff]  ;;  %v600_v44 = vpack.c.bf16 %v363_v43, %v362_v42  ;;  %v346_v45 = vld [vmem:[#allocation8 + $0x10] sm:$0xff] }
  0x4f   :  { %553 = vmatprep.subr.bf16.mxu0 %v552_v17  ;;  %v562_v35 = vpack.c.bf16 %v130_v33, %v126_v32  ;;  %v360_v36 = vld [vmem:[#allocation8 + $0x80] sm:$0xff]  ;;  %v347_v46 = vld [vmem:[#allocation8 + $0x18] sm:$0xff]  ;;  %v365_v48 = vld [vmem:[#allocation8 + $0xa8] sm:$0xff] }
  0x50   :  { %587 = vmatpush1.bf16.msra.mxu1 %v586_v63  ;;  %v596_v38 = vpack.c.bf16 %v361_v37, %v360_v36  ;;  %v344_v39 = vld [vmem:[#allocation8] sm:$0xff]  ;;  %v602_v47 = vpack.c.bf16 %v347_v46, %v346_v45  ;;  %v349_v51 = vld [vmem:[#allocation8 + $0x28] sm:$0xff]  ;;  %v366_v53 = vld [vmem:[#allocation8 + $0xb0] sm:$0xff] }
  0x51   :  { %589 = vmatprep.subr.bf16.mxu1 %v588_v1  ;;  %v598_v41 = vpack.c.bf16 %v345_v40, %v344_v39  ;;  %v348_v50 = vld [vmem:[#allocation8 + $0x20] sm:$0xff]  ;;  %v367_v54 = vld [vmem:[#allocation8 + $0xb8] sm:$0xff]  ;;  %v350_v56 = vld [vmem:[#allocation8 + $0x30] sm:$0xff] }
  0x52   :  { %555 = vmatpush1.bf16.msra.mxu0 %v554_v23  ;;  %v606_v52 = vpack.c.bf16 %v349_v51, %v348_v50  ;;  %v608_v55 = vpack.c.bf16 %v367_v54, %v366_v53  ;;  %v351_v57 = vld [vmem:[#allocation8 + $0x38] sm:$0xff]  ;;  %v368_v59 = vld [vmem:[#allocation8 + $0xc0] sm:$0xff]  ;;  %v369_v60 = vld [vmem:[#allocation8 + $0xc8] sm:$0xff]  ;;  %v142_v50 = vsub.s32 1, %v137_v21 }
  0x53   :  { %557 = vmatprep.subr.bf16.mxu0 %v556_v24  ;;  %v610_v58 = vpack.c.bf16 %v351_v57, %v350_v56  ;;  %v612_v61 = vpack.c.bf16 %v369_v60, %v368_v59  ;;  %v352_v62 = vld [vmem:[#allocation8 + $0x40] sm:$0xff]  ;;  %v353_v63 = vld [vmem:[#allocation8 + $0x48] sm:$0xff]  ;;  %v370_v2 = vld [vmem:[#allocation8 + $0xd0] sm:$0xff]  ;;  %v150_v24 = vsub.s32 3, %v137_v21 }
  0x54   :  { %591 = vmatpush1.bf16.msra.mxu1 %v590_v12  ;;  %v614_v1 = vpack.c.bf16 %v353_v63, %v352_v62  ;;  %v371_v3 = vld [vmem:[#allocation8 + $0xd8] sm:$0xff]  ;;  %v354_v5 = vld [vmem:[#allocation8 + $0x50] sm:$0xff]  ;;  %v372_v8 = vld [vmem:[#allocation8 + $0xe0] sm:$0xff] }
  0x55   :  { %593 = vmatprep.subr.bf16.mxu1 %v592_v13  ;;  %v616_v4 = vpack.c.bf16 %v371_v3, %v370_v2  ;;  %v355_v6 = vld [vmem:[#allocation8 + $0x58] sm:$0xff]  ;;  %v373_v9 = vld [vmem:[#allocation8 + $0xe8] sm:$0xff]  ;;  %v356_v11 = vld [vmem:[#allocation8 + $0x60] sm:$0xff] }
  0x56   :  { %559 = vmatpush1.bf16.msra.mxu0 %v558_v30  ;;  %v618_v7 = vpack.c.bf16 %v355_v6, %v354_v5  ;;  %v620_v10 = vpack.c.bf16 %v373_v9, %v372_v8  ;;  %v357_v12 = vld [vmem:[#allocation8 + $0x68] sm:$0xff]  ;;  %v374_v14 = vld [vmem:[#allocation8 + $0xf0] sm:$0xff]  ;;  %v375_v15 = vld [vmem:[#allocation8 + $0xf8] sm:$0xff] }
  0x57   :  { %561 = vmatprep.subr.bf16.mxu0 %v560_v31  ;;  %v622_v13 = vpack.c.bf16 %v357_v12, %v356_v11  ;;  %v624_v16 = vpack.c.bf16 %v375_v15, %v374_v14  ;;  %v358_v17 = vld [vmem:[#allocation8 + $0x70] sm:$0xff]  ;;  %v359_v18 = vld [vmem:[#allocation8 + $0x78] sm:$0xff] }
  0x58   :  { %595 = vmatpush1.bf16.msra.mxu1 %v594_v22  ;;  %v626_v19 = vpack.c.bf16 %v359_v18, %v358_v17  ;;  %v146_v22 = vsub.s32 2, %v137_v21  ;;  %v134_v23 = vld [vmem:[%s871_s2] sm:$0xf] }
  0x59   :  { %628 = vmatprep.subr.bf16.mxu1 %v596_v38  ;;  %v151_v26 = vrot.slane %v134_v23, %v150_v24  ;;  %v143_v53 = vrot.slane %v134_v23, %v142_v50  ;;  %v493_v9 = vld [vmem:[%s873_s4] ss:$0 sm:$0xff] }
  0x5a   :  { %563 = vmatpush1.bf16.msra.mxu0 %v562_v35  ;;  %v147_v25 = vrot.slane %v134_v23, %v146_v22 }
  0x5b   :  { %298 = vmatmul.mubr.f32.vlgmr.msra.gmra.mrb[0].mxu1 %v68_v29  ;;  %597 = vmatprep.subr.bf16.mxu0 %v596_v38 }
  0x5c   :  { %303 = vmatprep.mubr.f32.mxu1 %v770_v0  ;;  %636 = vmatpush3.bf16.msra.mxu1 %v598_v41 }
  0x5d   :  { %221 = vmatmul.mubr.f32.vlgmr.msra.gmra.mrb[0].mxu0 %v68_v29  ;;  %629 = vmatprep.subr.bf16.mxu1 %v600_v44 }
  0x5e   :  { %226 = vmatprep.mubr.f32.mxu0 %v770_v0  ;;  %599 = vmatpush3.bf16.msra.mxu0 %v598_v41  ;;  %v364_v0 = vld [vmem:[#allocation8 + $0xa0] sm:$0xff] }
  0x5f   :  { %304 = vmatmul.mubr.f32.gmra.mrb[2].mxu1 %v69_v34  ;;  %601 = vmatprep.subr.bf16.mxu0 %v600_v44  ;;  %v604_v49 = vpack.c.bf16 %v365_v48, %v364_v0  ;;  %v138_v0 = vsub.s32 0, %v137_v21 }
  0x60   :  { %637 = vmatpush3.bf16.msra.mxu1 %v602_v47 }
  0x61   :  { %227 = vmatmul.mubr.f32.gmra.mrb[2].mxu0 %v69_v34  ;;  %630 = vmatprep.subr.bf16.mxu1 %v604_v49 }
  0x62   :  { %603 = vmatpush3.bf16.msra.mxu0 %v602_v47 }
  0x63   :  { %605 = vmatprep.subr.bf16.mxu0 %v604_v49 }
  0x64   :  { %638 = vmatpush3.bf16.msra.mxu1 %v606_v52 }
  0x65   :  { %631 = vmatprep.subr.bf16.mxu1 %v608_v55 }
  0x66   :  { %607 = vmatpush3.bf16.msra.mxu0 %v606_v52  ;;  %v139_v52 = vrot.slane %v134_v23, %v138_v0 }
  0x67   :  { %609 = vmatprep.subr.bf16.mxu0 %v608_v55 }
  0x68   :  { %639 = vmatpush3.bf16.msra.mxu1 %v610_v58 }
  0x69   :  { %632 = vmatprep.subr.bf16.mxu1 %v612_v61 }
  0x6a   :  { %611 = vmatpush3.bf16.msra.mxu0 %v610_v58 }
  0x6b   :  { %613 = vmatprep.subr.bf16.mxu0 %v612_v61 }
  0x6c   :  { %640 = vmatpush3.bf16.msra.mxu1 %v614_v1 }
  0x6d   :  { %633 = vmatprep.subr.bf16.mxu1 %v616_v4 }
  0x6e   :  { %615 = vmatpush3.bf16.msra.mxu0 %v614_v1 }
  0x6f   :  { %617 = vmatprep.subr.bf16.mxu0 %v616_v4 }
  0x70   :  { %641 = vmatpush3.bf16.msra.mxu1 %v618_v7 }
  0x71   :  { %634 = vmatprep.subr.bf16.mxu1 %v620_v10 }
  0x72   :  { %619 = vmatpush3.bf16.msra.mxu0 %v618_v7 }
  0x73   :  { %621 = vmatprep.subr.bf16.mxu0 %v620_v10 }
  0x74   :  { %642 = vmatpush3.bf16.msra.mxu1 %v622_v13 }
  0x75   :  { %635 = vmatprep.subr.bf16.mxu1 %v624_v16 }
  0x76   :  { %623 = vmatpush3.bf16.msra.mxu0 %v622_v13 }
  0x77   :  { %625 = vmatprep.subr.bf16.mxu0 %v624_v16 }
  0x78   :  { %643 = vmatpush3.bf16.msra.mxu1 %v626_v19 }
  0x7a   :  { %627 = vmatpush3.bf16.msra.mxu0 %v626_v19 }
 0x12e   :  { %v299_v27 = vpop.f32.mrb[0].mxu1 }
 0x12f   :  { %v300_v28 = vadd.f32 %v299_v27, %v147_v25  ;;  %v301_v29 = vpop.f32.mrb[1].mxu1 }
 0x130   :  { %v302_v30 = vadd.f32 %v301_v29, %v151_v26  ;;  %v222_v39 = vpop.f32.mrb[0].mxu0 }
 0x131   :  { %v489_v31 = vmul.f32 -1.442695, %v300_v28  ;;  %v224_v40 = vpop.f32.mrb[1].mxu0  ;;  %v223_v54 = vadd.f32 %v222_v39, %v139_v52 }
 0x132   :  { %v490_v32 = vmul.f32 -1.442695, %v302_v30  ;;  %v305_v33 = vpop.f32.mrb[2].mxu1  ;;  %v225_v56 = vadd.f32 %v224_v40, %v143_v53 }
 0x133   :  { %653 = vpow2.f32 %v489_v31  ;;  %v306_v34 = vadd.f32 %v305_v33, %v147_v25  ;;  %v307_v35 = vpop.f32.mrb[3].mxu1 }
 0x134   :  { %655 = vpow2.f32 %v490_v32  ;;  %v308_v36 = vadd.f32 %v307_v35, %v151_v26  ;;  %v228_v41 = vpop.f32.mrb[2].mxu0 }
 0x135   :  { %v491_v37 = vmul.f32 -1.442695, %v306_v34  ;;  %v230_v42 = vpop.f32.mrb[3].mxu0  ;;  %v229_v61 = vadd.f32 %v228_v41, %v139_v52 }
 0x136   :  { %v492_v38 = vmul.f32 -1.442695, %v308_v36  ;;  %v231_v1 = vadd.f32 %v230_v42, %v143_v53 }
 0x137   :  { %657 = vpow2.f32 %v491_v37 }
 0x138   :  { %659 = vpow2.f32 %v492_v38 }
 0x13d   :  { %v654_v43 = vpop.eup %653 }
 0x13e   :  { %v656_v44 = vpop.eup %655  ;;  %v322_v45 = vadd.f32 1.0, %v654_v43 }
 0x13f   :  { %v323_v46 = vadd.f32 1.0, %v656_v44 }
 0x140   :  { %661 = vrcp.f32 %v322_v45 }
 0x141   :  { %v658_v47 = vpop.eup %657  ;;  %663 = vrcp.f32 %v323_v46 }
 0x142   :  { %v660_v48 = vpop.eup %659  ;;  %v324_v49 = vadd.f32 1.0, %v658_v47 }
 0x143   :  { %v325_v51 = vadd.f32 1.0, %v660_v48 }
 0x144   :  { %665 = vrcp.f32 %v324_v49 }
 0x145   :  { %667 = vrcp.f32 %v325_v51 }
 0x14a   :  { %v662_v55 = vpop.eup %661 }
 0x14b   :  { %v664_v57 = vpop.eup %663  ;;  %v334_v58 = vmul.f32 %v662_v55, %v300_v28 }
 0x14c   :  { %v335_v59 = vmul.f32 %v664_v57, %v302_v30 }
 0x14d   :  { %v338_v60 = vmul.f32 %v334_v58, %v223_v54 }
 0x14e   :  { %v666_v62 = vpop.eup %665  ;;  %v339_v63 = vmul.f32 %v335_v59, %v225_v56 }
 0x14f   :  { %v668_v2 = vpop.eup %667  ;;  %v336_v3 = vmul.f32 %v666_v62, %v306_v34 }
 0x150   :  { %v337_v4 = vmul.f32 %v668_v2, %v308_v36  ;;  %440 = vmatprep.mubr.f32.mxu0 %v339_v63 }
 0x151   :  { %v340_v5 = vmul.f32 %v336_v3, %v229_v61  ;;  %441 = vmatmul.mubr.f32.vlgmr.msra.gmra.mrb[4].mxu0 %v338_v60 }
 0x152   :  { %v341_v6 = vmul.f32 %v337_v4, %v231_v1 }
 0x154   :  { %445 = vmatprep.mubr.f32.mxu1 %v341_v6 }
 0x155   :  { %446 = vmatmul.mubr.f32.vlgmr.msra.gmra.mrb[4].mxu1 %v340_v5 }
 0x224   :  { %v526_v7 = vpop.f32.mrb[4].mxu0 }
 0x225   :  { %v527_v8 = vpop.f32.mrb[5].mxu0 }
 0x226   :  { %v528_v10 = vadd.f32 %v527_v8, %v526_v7 }
 0x228   :  { %v467_v11 = vadd.f32 %v528_v10, %v493_v9  ;;  %v529_v12 = vpop.f32.mrb[4].mxu1 }
 0x229   :  { %v530_v13 = vpop.f32.mrb[5].mxu1 }
 0x22a   :  { %469 = vst [vmem:[#allocation9] sm:$0xff] %v467_v11  ;;  %v531_v14 = vadd.f32 %v530_v13, %v529_v12 }
 0x22c   :  { %v468_v15 = vadd.f32 %v531_v14, %v493_v9 }
 0x22e   :  { %470 = vst [vmem:[#allocation9 + $0x8] sm:$0xff] %v468_v15 }
 0x22f   :  { %746 = shalt.err (!%p743_p0)
}
 0x230   :  { %s747_s12 = scalar_lea.hbm %s874_s5, 256 }
 0x231   :  { %p748_p1 = scmp.ne.s32.totalorder %s874_s5, %s747_s12  ;;  %p751_p2 = scmp.lt.u32.totalorder %s747_s12, %s874_s5 }
 0x233   :  { %p753_p3 = pnand %p751_p2, %p748_p1 }
 0x235   :  { %756 = shalt.err (!%p753_p3)
}
 0x236   :  { %482 = dma.vmem_to_hbm [thread:$0]  %s477_s9, 256, %s874_s5, [#allocation5], %s767_s1, %s767_s1, %s768_s17  }
 0x237   :  { %761 = dma.done.wait [#allocation5], 256  }
 0x238   :  { %762 = vsyncadd [#allocation5], 4294967040 }
 0x239   :  { %486 = vsyncpa [#allocation4], 1 }
 0x23a   :  { %487 = vsyncpa [#allocation7], 1 }
 0x23b   :  { %488 = vsyncpa [#allocation5], 1 }

</bundles_post_ra>
